<compile_context>
chip_gen: v5e
topology: v5e:2x2
jax: 0.10.0
libtpu: 0.0.40
codegen_flags: <defaults>
</compile_context>

<pallas_src>
import numpy as np

import jax
import jax.numpy as jnp
from jax.experimental import pallas as pl
from jax.experimental.pallas import tpu as pltpu

# ------------------------- hparams / shapes -------------------------
LATENT_DIM = 10
MATCH_SHAPE = (8, 16)       # reshape target; after transpose: C=16, L=8
OUTPUT_SHAPE = (16, 16)     # output_shape[1] = final conv out_channels
DEC_FILTERS = 16
DEC_KERNEL_SIZE = 3
SCALE_FACTOR = 2

L0 = MATCH_SHAPE[0]                 # length before upsample (8)
C = MATCH_SHAPE[1]                  # channels (16)
L1 = L0 * SCALE_FACTOR              # length after upsample (16)
C_OUT = OUTPUT_SHAPE[1]             # final conv out_channels (16)


# ------------------------- fused Pallas kernel -------------------------
def _decoder_fused_kernel(z_ref, mw_ref, mb_ref, mwu_ref, mbu_ref,
                          w01_ref, b01_ref, w02u_ref, b02u_ref,
                          w11_ref, b11_ref, w12_ref, b12_ref,
                          wf_ref, bf_ref, o_ref):
    """Whole ResnetDecoder forward on VMEM-resident operands.

    Activations are flat NLC rows (B, L*C).  Each conv is one MXU matmul
    against a host-prebuilt dense (block-banded) matrix; the upsample and the
    final NLC->NCL transpose are already folded into those matrices.
    """
    dot = lambda a, b: jnp.dot(a, b, preferred_element_type=jnp.float32)
    relu = lambda v: jnp.maximum(v, 0.0)

    z = z_ref[...]                                              # (B, latent)

    # match layer: Linear + Sigmoid.  m8 = narrow (L=8) stream, m16 = the same
    # values with the nearest-upsample column duplication already applied
    # (exact: mwu/mbu are pure column copies of mw/mb).
    m8 = jax.nn.sigmoid(dot(z, mw_ref[...]) + mb_ref[...])       # (B, 128)
    m16 = jax.nn.sigmoid(dot(z, mwu_ref[...]) + mbu_ref[...])    # (B, 256)

    # ResidualConv1d #0 : x = m + relu(conv2(relu(conv1(m))))
    h8 = relu(dot(m8, w01_ref[...]) + b01_ref[...])              # (B, 128)
    xr16 = relu(dot(h8, w02u_ref[...]) + b02u_ref[...])          # (B, 256)
    # x16 == Upsample(scale=2, nearest)(m8 + relu(conv2(h8)))  (exact)
    x16 = m16 + xr16                                             # (B, 256)

    # ResidualConv1d #1 at L=16
    h16 = relu(dot(x16, w11_ref[...]) + b11_ref[...])            # (B, 256)
    r16 = relu(dot(h16, w12_ref[...]) + b12_ref[...])            # (B, 256)

    # Final Conv1d + Sigmoid on (x16 + r16).  The NLC->NCL transpose is folded
    # into wf/bf columns, so this single store is flat & lane-dense.
    y = jax.nn.sigmoid(dot(x16 + r16, wf_ref[...]) + bf_ref[...])
    o_ref[...] = y.astype(o_ref.dtype)


# ------------------------- host-side parameter prep -------------------------
def _conv_as_dense(w, b, L):
    """'same'-padding stride-1 Conv1d taps (K, Cin, Cout) -> dense matrix
    (L*Cin, L*Cout) acting on flat NLC rows, plus bias tiled over L."""
    w = np.asarray(w, np.float32)
    b = np.asarray(b, np.float32)
    K, Cin, Cout = w.shape
    pad = (K - 1) // 2                        # odd kernel, 'same' padding
    W = np.zeros((L * Cin, L * Cout), np.float32)
    for l in range(L):                        # output position
        for t in range(K):                    # tap
            src = l + t - pad                 # input position (zero padded)
            if 0 <= src < L:
                W[src * Cin:(src + 1) * Cin, l * Cout:(l + 1) * Cout] = w[t]
    return W, np.tile(b, L)                   # bias index: l*Cout + f


def prepare_fused_params(p):
    """Re-layout raw (PyTorch-style) parameters into the dense matrices the
    fused kernel consumes.  Done once on the host; exact (no weight sums)."""
    # wide column j = l_out*C + c  ->  narrow column (l_out//2)*C + c
    j = np.arange(L1 * C)
    up_idx = (j // C // SCALE_FACTOR) * C + (j % C)

    mw = np.asarray(p["match_w"], np.float32)                 # (latent, 128)
    mb = np.asarray(p["match_b"], np.float32)                 # (128,)

    w01, b01 = _conv_as_dense(p["r0_w1"], p["r0_b1"], L0)     # (128, 128)
    w02, b02 = _conv_as_dense(p["r0_w2"], p["r0_b2"], L0)     # (128, 128)
    w11, b11 = _conv_as_dense(p["r1_w1"], p["r1_b1"], L1)     # (256, 256)
    w12, b12 = _conv_as_dense(p["r1_w2"], p["r1_b2"], L1)     # (256, 256)
    wf, bf = _conv_as_dense(p["fin_w"], p["fin_b"], L1)       # (256, 256)

    # fold nearest-upsample: pure column duplication (exact, no arithmetic)
    mwu, mbu = mw[:, up_idx], mb[up_idx]                      # (latent,256),(256,)
    w02u, b02u = w02[:, up_idx], b02[up_idx]                  # (128,256),(256,)

    # fold the final NLC->NCL transpose into the last conv's columns/bias
    perm = np.arange(L1 * C_OUT).reshape(L1, C_OUT).T.reshape(-1)
    wf_p, bf_p = wf[:, perm], bf[perm]

    mat = lambda a: jnp.asarray(a, jnp.float32)
    row = lambda a: jnp.asarray(a, jnp.float32).reshape(1, -1)
    return dict(
        mw=mat(mw), mb=row(mb), mwu=mat(mwu), mbu=row(mbu),
        w01=mat(w01), b01=row(b01), w02u=mat(w02u), b02u=row(b02u),
        w11=mat(w11), b11=row(b11), w12=mat(w12), b12=row(b12),
        wf=mat(wf_p), bf=row(bf_p),
    )


# ------------------------- wrapper -------------------------
def resnet_decoder_forward(z, fp):
    """z: (B, latent_dim) -> (B, C_out, L) in PyTorch NCL layout."""
    B = z.shape[0]
    args = (z,
            fp["mw"], fp["mb"], fp["mwu"], fp["mbu"],
            fp["w01"], fp["b01"], fp["w02u"], fp["b02u"],
            fp["w11"], fp["b11"], fp["w12"], fp["b12"],
            fp["wf"], fp["bf"])
    out_flat = pl.pallas_call(
        _decoder_fused_kernel,
        out_shape=jax.ShapeDtypeStruct((B, C_OUT * L1), jnp.float32),
        # everything is tiny: full arrays resident in VMEM, no grid, no
        # multi-buffering, single launch.
        in_specs=[pl.BlockSpec(memory_space=pltpu.MemorySpace.VMEM)
                  for _ in args],
        out_specs=pl.BlockSpec(memory_space=pltpu.MemorySpace.VMEM),
    )(*args)
    # flat NCL -> (B, C_out, L); the transpose itself already happened inside
    # the kernel via the permuted final-conv columns.
    return out_flat.reshape(B, C_OUT, L1)


# ------------------------- params (deterministic, synthetic) -------------------------
def init_params(key):
    keys = jax.random.split(key, 12)

    def nrm(k, shape, scale=0.1):
        return (scale * jax.random.normal(k, shape)).astype(jnp.float32)

    K = DEC_KERNEL_SIZE
    F = DEC_FILTERS
    P = MATCH_SHAPE[0] * MATCH_SHAPE[1]
    return dict(
        match_w=nrm(keys[0], (LATENT_DIM, P)), match_b=nrm(keys[1], (P,)),
        r0_w1=nrm(keys[2], (K, C, F)), r0_b1=nrm(keys[3], (F,)),
        r0_w2=nrm(keys[4], (K, F, C)), r0_b2=nrm(keys[5], (C,)),
        r1_w1=nrm(keys[6], (K, C, F)), r1_b1=nrm(keys[7], (F,)),
        r1_w2=nrm(keys[8], (K, F, C)), r1_b2=nrm(keys[9], (C,)),
        fin_w=nrm(keys[10], (K, C, C_OUT)), fin_b=nrm(keys[11], (C_OUT,)),
    )


# ------------------------- pure-JAX reference (sanity check) -------------------------
def _conv1d_ref(x, w, b):
    K = w.shape[0]
    pad = (K - 1) // 2
    L = x.shape[1]
    xp = jnp.pad(x, ((0, 0), (pad, pad), (0, 0)))
    out = sum(jnp.einsum("blc,cf->blf", xp[:, t:t + L, :], w[t]) for t in range(K))
    return out + b


def reference_forward(z, p):
    x = jax.nn.sigmoid(z @ p["match_w"] + p["match_b"])
    x = x.reshape(z.shape[0], MATCH_SHAPE[0], MATCH_SHAPE[1])      # (B, L, C) NLC
    h = jax.nn.relu(_conv1d_ref(x, p["r0_w1"], p["r0_b1"]))
    x = x + jax.nn.relu(_conv1d_ref(h, p["r0_w2"], p["r0_b2"]))
    x = jnp.repeat(x, SCALE_FACTOR, axis=1)                        # nearest upsample
    h = jax.nn.relu(_conv1d_ref(x, p["r1_w1"], p["r1_b1"]))
    x = x + jax.nn.relu(_conv1d_ref(h, p["r1_w2"], p["r1_b2"]))
    x = jax.nn.sigmoid(_conv1d_ref(x, p["fin_w"], p["fin_b"]))
    return jnp.transpose(x, (0, 2, 1))                             # NCL


if __name__ == "__main__":
    key = jax.random.PRNGKey(0)
    kp, kz = jax.random.split(key)
    params = init_params(kp)
    z = jax.random.normal(kz, (2, LATENT_DIM), dtype=jnp.float32)  # latent embedding

    fused = prepare_fused_params(params)                           # host-side, once

    out = jax.block_until_ready(resnet_decoder_forward(z, fused))
    ref = jax.block_until_ready(reference_forward(z, params))

    assert out.shape == (2, C_OUT, L1), out.shape                  # (B, C_out, L) NCL
    # small slack for f32 accumulation-order differences (one wide matmul in
    # the kernel vs per-tap sums in the XLA reference)
    assert jnp.allclose(out, ref, atol=2e-5, rtol=2e-5), (
        "mismatch vs reference: max abs err = "
        f"{float(jnp.max(jnp.abs(out - ref)))}")
    print("KERNEL_OK")
</pallas_src>

<mosaic_0001>
module attributes {stable_mosaic.version = 11 : i64} {
  func.func @_decoder_fused_kernel(%arg0: memref<2x10xf32, #tpu.memory_space<vmem>>, %arg1: memref<10x128xf32, #tpu.memory_space<vmem>>, %arg2: memref<1x128xf32, #tpu.memory_space<vmem>>, %arg3: memref<10x256xf32, #tpu.memory_space<vmem>>, %arg4: memref<1x256xf32, #tpu.memory_space<vmem>>, %arg5: memref<128x128xf32, #tpu.memory_space<vmem>>, %arg6: memref<1x128xf32, #tpu.memory_space<vmem>>, %arg7: memref<128x256xf32, #tpu.memory_space<vmem>>, %arg8: memref<1x256xf32, #tpu.memory_space<vmem>>, %arg9: memref<256x256xf32, #tpu.memory_space<vmem>>, %arg10: memref<1x256xf32, #tpu.memory_space<vmem>>, %arg11: memref<256x256xf32, #tpu.memory_space<vmem>>, %arg12: memref<1x256xf32, #tpu.memory_space<vmem>>, %arg13: memref<256x256xf32, #tpu.memory_space<vmem>>, %arg14: memref<1x256xf32, #tpu.memory_space<vmem>>, %arg15: memref<2x256xf32, #tpu.memory_space<vmem>>) attributes {dimension_semantics = [], scalar_prefetch = 0 : i64, scratch_operands = 0 : i64, tpu.core_type = #tpu.core_type<tc>} {
    %c0 = arith.constant 0 : index
    %c0_0 = arith.constant 0 : index
    %0 = vector.load %arg0[%c0, %c0_0] : memref<2x10xf32, #tpu.memory_space<vmem>>, vector<2x10xf32>
    %c0_1 = arith.constant 0 : index
    %c0_2 = arith.constant 0 : index
    %1 = vector.load %arg1[%c0_1, %c0_2] : memref<10x128xf32, #tpu.memory_space<vmem>>, vector<10x128xf32>
    %cst = arith.constant dense<0.000000e+00> : vector<2x128xf32>
    %2 = tpu.matmul %0, %1, %cst {dimension_numbers = #tpu.dot_dimension_numbers<[1], [0], [0], [1], [0, 0, 1, 1], [], []>} : vector<2x10xf32>, vector<10x128xf32>, vector<2x128xf32> -> vector<2x128xf32>
    %c0_3 = arith.constant 0 : index
    %c0_4 = arith.constant 0 : index
    %3 = vector.load %arg2[%c0_3, %c0_4] : memref<1x128xf32, #tpu.memory_space<vmem>>, vector<1x128xf32>
    %4 = vector.broadcast %3 : vector<1x128xf32> to vector<2x128xf32>
    %5 = arith.addf %2, %4 : vector<2x128xf32>
    %6 = arith.negf %5 : vector<2x128xf32>
    %7 = math.exp %6 : vector<2x128xf32>
    %cst_5 = arith.constant 1.000000e+00 : f32
    %8 = vector.broadcast %cst_5 : f32 to vector<2x128xf32>
    %9 = arith.addf %8, %7 : vector<2x128xf32>
    %10 = arith.divf %8, %9 : vector<2x128xf32>
    %c0_6 = arith.constant 0 : index
    %c0_7 = arith.constant 0 : index
    %11 = vector.load %arg3[%c0_6, %c0_7] : memref<10x256xf32, #tpu.memory_space<vmem>>, vector<10x256xf32>
    %cst_8 = arith.constant dense<0.000000e+00> : vector<2x256xf32>
    %12 = tpu.matmul %0, %11, %cst_8 {dimension_numbers = #tpu.dot_dimension_numbers<[1], [0], [0], [1], [0, 0, 1, 1], [], []>} : vector<2x10xf32>, vector<10x256xf32>, vector<2x256xf32> -> vector<2x256xf32>
    %c0_9 = arith.constant 0 : index
    %c0_10 = arith.constant 0 : index
    %13 = vector.load %arg4[%c0_9, %c0_10] : memref<1x256xf32, #tpu.memory_space<vmem>>, vector<1x256xf32>
    %14 = vector.broadcast %13 : vector<1x256xf32> to vector<2x256xf32>
    %15 = arith.addf %12, %14 : vector<2x256xf32>
    %16 = arith.negf %15 : vector<2x256xf32>
    %17 = math.exp %16 : vector<2x256xf32>
    %cst_11 = arith.constant 1.000000e+00 : f32
    %18 = vector.broadcast %cst_11 : f32 to vector<2x256xf32>
    %19 = arith.addf %18, %17 : vector<2x256xf32>
    %20 = arith.divf %18, %19 : vector<2x256xf32>
    %c0_12 = arith.constant 0 : index
    %c0_13 = arith.constant 0 : index
    %21 = vector.load %arg5[%c0_12, %c0_13] : memref<128x128xf32, #tpu.memory_space<vmem>>, vector<128x128xf32>
    %cst_14 = arith.constant dense<0.000000e+00> : vector<2x128xf32>
    %22 = tpu.matmul %10, %21, %cst_14 {dimension_numbers = #tpu.dot_dimension_numbers<[1], [0], [0], [1], [0, 0, 1, 1], [], []>} : vector<2x128xf32>, vector<128x128xf32>, vector<2x128xf32> -> vector<2x128xf32>
    %c0_15 = arith.constant 0 : index
    %c0_16 = arith.constant 0 : index
    %23 = vector.load %arg6[%c0_15, %c0_16] : memref<1x128xf32, #tpu.memory_space<vmem>>, vector<1x128xf32>
    %24 = vector.broadcast %23 : vector<1x128xf32> to vector<2x128xf32>
    %25 = arith.addf %22, %24 : vector<2x128xf32>
    %cst_17 = arith.constant 0.000000e+00 : f32
    %26 = vector.broadcast %cst_17 : f32 to vector<2x128xf32>
    %27 = arith.maximumf %25, %26 : vector<2x128xf32>
    %c0_18 = arith.constant 0 : index
    %c0_19 = arith.constant 0 : index
    %28 = vector.load %arg7[%c0_18, %c0_19] : memref<128x256xf32, #tpu.memory_space<vmem>>, vector<128x256xf32>
    %cst_20 = arith.constant dense<0.000000e+00> : vector<2x256xf32>
    %29 = tpu.matmul %27, %28, %cst_20 {dimension_numbers = #tpu.dot_dimension_numbers<[1], [0], [0], [1], [0, 0, 1, 1], [], []>} : vector<2x128xf32>, vector<128x256xf32>, vector<2x256xf32> -> vector<2x256xf32>
    %c0_21 = arith.constant 0 : index
    %c0_22 = arith.constant 0 : index
    %30 = vector.load %arg8[%c0_21, %c0_22] : memref<1x256xf32, #tpu.memory_space<vmem>>, vector<1x256xf32>
    %31 = vector.broadcast %30 : vector<1x256xf32> to vector<2x256xf32>
    %32 = arith.addf %29, %31 : vector<2x256xf32>
    %cst_23 = arith.constant 0.000000e+00 : f32
    %33 = vector.broadcast %cst_23 : f32 to vector<2x256xf32>
    %34 = arith.maximumf %32, %33 : vector<2x256xf32>
    %35 = arith.addf %20, %34 : vector<2x256xf32>
    %c0_24 = arith.constant 0 : index
    %c0_25 = arith.constant 0 : index
    %36 = vector.load %arg9[%c0_24, %c0_25] : memref<256x256xf32, #tpu.memory_space<vmem>>, vector<256x256xf32>
    %cst_26 = arith.constant dense<0.000000e+00> : vector<2x256xf32>
    %37 = tpu.matmul %35, %36, %cst_26 {dimension_numbers = #tpu.dot_dimension_numbers<[1], [0], [0], [1], [0, 0, 1, 1], [], []>} : vector<2x256xf32>, vector<256x256xf32>, vector<2x256xf32> -> vector<2x256xf32>
    %c0_27 = arith.constant 0 : index
    %c0_28 = arith.constant 0 : index
    %38 = vector.load %arg10[%c0_27, %c0_28] : memref<1x256xf32, #tpu.memory_space<vmem>>, vector<1x256xf32>
    %39 = vector.broadcast %38 : vector<1x256xf32> to vector<2x256xf32>
    %40 = arith.addf %37, %39 : vector<2x256xf32>
    %cst_29 = arith.constant 0.000000e+00 : f32
    %41 = vector.broadcast %cst_29 : f32 to vector<2x256xf32>
    %42 = arith.maximumf %40, %41 : vector<2x256xf32>
    %c0_30 = arith.constant 0 : index
    %c0_31 = arith.constant 0 : index
    %43 = vector.load %arg11[%c0_30, %c0_31] : memref<256x256xf32, #tpu.memory_space<vmem>>, vector<256x256xf32>
    %cst_32 = arith.constant dense<0.000000e+00> : vector<2x256xf32>
    %44 = tpu.matmul %42, %43, %cst_32 {dimension_numbers = #tpu.dot_dimension_numbers<[1], [0], [0], [1], [0, 0, 1, 1], [], []>} : vector<2x256xf32>, vector<256x256xf32>, vector<2x256xf32> -> vector<2x256xf32>
    %c0_33 = arith.constant 0 : index
    %c0_34 = arith.constant 0 : index
    %45 = vector.load %arg12[%c0_33, %c0_34] : memref<1x256xf32, #tpu.memory_space<vmem>>, vector<1x256xf32>
    %46 = vector.broadcast %45 : vector<1x256xf32> to vector<2x256xf32>
    %47 = arith.addf %44, %46 : vector<2x256xf32>
    %cst_35 = arith.constant 0.000000e+00 : f32
    %48 = vector.broadcast %cst_35 : f32 to vector<2x256xf32>
    %49 = arith.maximumf %47, %48 : vector<2x256xf32>
    %50 = arith.addf %35, %49 : vector<2x256xf32>
    %c0_36 = arith.constant 0 : index
    %c0_37 = arith.constant 0 : index
    %51 = vector.load %arg13[%c0_36, %c0_37] : memref<256x256xf32, #tpu.memory_space<vmem>>, vector<256x256xf32>
    %cst_38 = arith.constant dense<0.000000e+00> : vector<2x256xf32>
    %52 = tpu.matmul %50, %51, %cst_38 {dimension_numbers = #tpu.dot_dimension_numbers<[1], [0], [0], [1], [0, 0, 1, 1], [], []>} : vector<2x256xf32>, vector<256x256xf32>, vector<2x256xf32> -> vector<2x256xf32>
    %c0_39 = arith.constant 0 : index
    %c0_40 = arith.constant 0 : index
    %53 = vector.load %arg14[%c0_39, %c0_40] : memref<1x256xf32, #tpu.memory_space<vmem>>, vector<1x256xf32>
    %54 = vector.broadcast %53 : vector<1x256xf32> to vector<2x256xf32>
    %55 = arith.addf %52, %54 : vector<2x256xf32>
    %56 = arith.negf %55 : vector<2x256xf32>
    %57 = math.exp %56 : vector<2x256xf32>
    %cst_41 = arith.constant 1.000000e+00 : f32
    %58 = vector.broadcast %cst_41 : f32 to vector<2x256xf32>
    %59 = arith.addf %58, %57 : vector<2x256xf32>
    %60 = arith.divf %58, %59 : vector<2x256xf32>
    %c0_42 = arith.constant 0 : index
    %c0_43 = arith.constant 0 : index
    %61 = vector.load %arg15[%c0_42, %c0_43] : memref<2x256xf32, #tpu.memory_space<vmem>>, vector<2x256xf32>
    tpu.vector_store %arg15[%c0_42, %c0_43], %60 {strides = array<i32>} : memref<2x256xf32, #tpu.memory_space<vmem>>, vector<2x256xf32>,
    return
  }
}

</mosaic_0001>

<bundles_post_ra>
// kernel: tpu_custom_call.1
= control target key start
LH: loop header
LB: loop body
LE: loop exit
PB: predicated region body
PF: predicated region fallthrough
CT: control target
= control target key end

     0   :  { %20 = vsyncpa [#allocation3], 0  ;;  %s1554_s0 = inlined_call_operand.hbm [shape: f32[2,10], index: 0, kind: input, shape index: {}]   ;;  %s1555_s1 = inlined_call_operand.hbm [shape: f32[10,128], index: 1, kind: input, shape index: {}]   ;;  %s1556_s2 = inlined_call_operand.hbm [shape: f32[1,128], index: 2, kind: input, shape index: {}]   ;;  %s1557_s3 = inlined_call_operand.hbm [shape: f32[10,256], index: 3, kind: input, shape index: {}]   ;;  %s1558_s4 = inlined_call_operand.vmem [shape: f32[1,256], index: 4, kind: input, shape index: {}]   ;;  %s1559_s5 = inlined_call_operand.hbm [shape: f32[128,128], index: 5, kind: input, shape index: {}]   ;;  %s1560_s6 = inlined_call_operand.hbm [shape: f32[1,128], index: 6, kind: input, shape index: {}]   ;;  %s1561_s7 = inlined_call_operand.hbm [shape: f32[128,256], index: 7, kind: input, shape index: {}]   ;;  %s1562_s8 = inlined_call_operand.vmem [shape: f32[1,256], index: 8, kind: input, shape index: {}]   ;;  %s1563_s9 = inlined_call_operand.hbm [shape: f32[256,256], index: 9, kind: input, shape index: {}]   ;;  %s1564_s10 = inlined_call_operand.vmem [shape: f32[1,256], index: 10, kind: input, shape index: {}]   ;;  %s1565_s11 = inlined_call_operand.hbm [shape: f32[256,256], index: 11, kind: input, shape index: {}]   ;;  %s1566_s12 = inlined_call_operand.vmem [shape: f32[1,256], index: 12, kind: input, shape index: {}]   ;;  %s1567_s13 = inlined_call_operand.hbm [shape: f32[256,256], index: 13, kind: input, shape index: {}]   ;;  %s1568_s14 = inlined_call_operand.vmem [shape: f32[1,256], index: 14, kind: input, shape index: {}]   ;;  %s1569_s15 = inlined_call_operand.hbm [shape: f32[2,256], index: 15, kind: output, shape index: {}]  }
   0x1   :  { %21 = vsyncpa [#allocation6], 0 }
   0x2   :  { %22 = vsyncpa [#allocation9], 0 }
   0x3   :  { %23 = vsyncpa [#allocation12], 0 }
   0x4   :  { %24 = vsyncpa [#allocation15], 0 }
   0x5   :  { %25 = vsyncpa [#allocation18], 0  ;;  %s42_s20 = sshll.u32 %s1555_s1, 4  ;;  %s43_s20 = int_to_ptr.hbm [resolvable:$true] %s42_s20 }
   0x6   :  { %26 = vsyncpa [#allocation4], 0  ;;  %s1320_s21 = smov [#allocation5]   ;;  %s66_s25 = sshll.u32 %s1557_s3, 4  ;;  %s67_s25 = int_to_ptr.hbm [resolvable:$true] %s66_s25 }
   0x7   :  { %s44_s22 = sshll.u32 %s1320_s21, 4  ;;  %s1570_s26 = smov 128   ;;  %s45_s22 = int_to_ptr.vmem [resolvable:$true] %s44_s22 }
   0x8   :  { %s1322_s27 = smov 8   ;;  %s1323_s28 = smov [#allocation8]  }
   0x9   :  { %50 = dma.hbm_to_vmem [thread:$0]  %s43_s20, 256, %s45_s22, [#allocation6], %s1570_s26, %s1570_s26, %s1322_s27  }
   0xa   :  { %s68_s29 = sshll.u32 %s1323_s28, 4  ;;  %s1324_s1 = smov 256   ;;  %s69_s29 = int_to_ptr.vmem [resolvable:$true] %s68_s29 }
   0xb   :  { %s1325_s30 = smov 16   ;;  %s95_s3 = sshll.u32 %s1560_s6, 4  ;;  %s96_s3 = int_to_ptr.hbm [resolvable:$true] %s95_s3 }
   0xc   :  { %74 = dma.hbm_to_vmem [thread:$0]  %s67_s25, 512, %s69_s29, [#allocation9], %s1324_s1, %s1324_s1, %s1325_s30  }
   0xd   :  { %s1326_s18 = smov [#allocation11]   ;;  %s120_s22 = sshll.u32 %s1563_s9, 4  ;;  %s121_s22 = int_to_ptr.hbm [resolvable:$true] %s120_s22 }
   0xe   :  { %s97_s19 = sshll.u32 %s1326_s18, 4  ;;  %s1327_s23 = smov [#allocation14]   ;;  %s98_s19 = int_to_ptr.vmem [resolvable:$true] %s97_s19 }
   0xf   :  { %100 = dma.hbm_to_vmem [thread:$0]  %s96_s3, 16, %s98_s19, [#allocation12]  }
  0x10   :  { %s122_s24 = sshll.u32 %s1327_s23, 4  ;;  %s32_s25 = sshll.u32 %s1554_s0, 4  ;;  %s123_s24 = int_to_ptr.vmem [resolvable:$true] %s122_s24  ;;  %s33_s25 = int_to_ptr.hbm [resolvable:$true] %s32_s25 }
  0x11   :  { %128 = dma.hbm_to_vmem [thread:$0]  %s121_s22, 8192, %s123_s24, [#allocation15], %s1324_s1, %s1324_s1, %s1325_s30  }
  0x12   :  { %s56_s16 = sshll.u32 %s1556_s2, 4  ;;  %s1328_s17 = smov [#allocation2]   ;;  %s57_s16 = int_to_ptr.hbm [resolvable:$true] %s56_s16 }
  0x13   :  { %s34_s9 = sshll.u32 %s1328_s17, 4  ;;  %s1329_s3 = smov [#allocation7]   ;;  %s35_s9 = int_to_ptr.vmem [resolvable:$true] %s34_s9 }
  0x14   :  { %37 = dma.hbm_to_vmem [thread:$0]  %s33_s25, 32, %s35_s9, [#allocation3]  }
  0x15   :  { %s58_s18 = sshll.u32 %s1329_s3, 4  ;;  %s81_s0 = sshll.u32 %s1559_s5, 4  ;;  %s59_s18 = int_to_ptr.vmem [resolvable:$true] %s58_s18  ;;  %s82_s0 = int_to_ptr.hbm [resolvable:$true] %s81_s0 }
  0x16   :  { %61 = dma.hbm_to_vmem [thread:$0]  %s57_s16, 16, %s59_s18, [#allocation6]  }
  0x17   :  { %s105_s22 = sshll.u32 %s1561_s7, 4  ;;  %s1330_s23 = smov [#allocation10]   ;;  %s106_s22 = int_to_ptr.hbm [resolvable:$true] %s105_s22 }
  0x18   :  { %s83_s2 = sshll.u32 %s1330_s23, 4  ;;  %s1571_s24 = smov 128   ;;  %s84_s2 = int_to_ptr.vmem [resolvable:$true] %s83_s2 }
  0x19   :  { %89 = dma.hbm_to_vmem [thread:$0]  %s82_s0, 2048, %s84_s2, [#allocation9], %s1571_s24, %s1571_s24, %s1322_s27  }
  0x1a   :  { %s1331_s28 = smov [#allocation13]   ;;  %s135_s5 = sshll.u32 %s1565_s11, 4  ;;  %s136_s5 = int_to_ptr.hbm [resolvable:$true] %s135_s5 }
  0x1b   :  { %s107_s25 = sshll.u32 %s1331_s28, 4  ;;  %s150_s17 = sshll.u32 %s1567_s13, 4  ;;  %s108_s25 = int_to_ptr.vmem [resolvable:$true] %s107_s25  ;;  %s151_s17 = int_to_ptr.hbm [resolvable:$true] %s150_s17 }
  0x1c   :  { %113 = dma.hbm_to_vmem [thread:$0]  %s106_s22, 4096, %s108_s25, [#allocation12], %s1324_s1, %s1324_s1, %s1325_s30  }
  0x1d   :  { %s1332_s9 = smov [#allocation16]   ;;  %s1333_s27 = smov [#allocation17]  }
  0x1e   :  { %s137_s3 = sshll.u32 %s1332_s9, 4  ;;  %s152_s11 = sshll.u32 %s1333_s27, 4  ;;  %s138_s3 = int_to_ptr.vmem [resolvable:$true] %s137_s3  ;;  %s153_s11 = int_to_ptr.vmem [resolvable:$true] %s152_s11 }
  0x1f   :  { %143 = dma.hbm_to_vmem [thread:$0]  %s136_s5, 8192, %s138_s3, [#allocation15], %s1324_s1, %s1324_s1, %s1325_s30  }
  0x20   :  { %158 = dma.hbm_to_vmem [thread:$0]  %s151_s17, 8192, %s153_s11, [#allocation18], %s1324_s1, %s1324_s1, %s1325_s30  }
  0x21   :  { %1306 = dma.done.wait [#allocation3], 32  }
  0x22   :  { %1307 = vsyncadd [#allocation3], 4294967264 }
  0x23   :  { %1308 = dma.done.wait [#allocation6], 272  }
  0x24   :  { %1309 = vsyncadd [#allocation6], 4294967024 }
  0x25   :  { %1310 = dma.done.wait [#allocation9], 2560  }
  0x26   :  { %1311 = vsyncadd [#allocation9], 4294964736 }
  0x27   :  { %1312 = dma.done.wait [#allocation12], 4112  }
  0x28   :  { %1313 = vsyncadd [#allocation12], 4294963184 }
  0x29   :  { %1314 = dma.done.wait [#allocation15], 16384  }
  0x2a   :  { %1315 = vsyncadd [#allocation15], 4294950912 }
  0x2b   :  { %1316 = dma.done.wait [#allocation18], 8192  }
  0x2c   :  { %1317 = vsyncadd [#allocation18], 4294959104  ;;  %vm212_vm0 = vcmask 1041408   ;;  %v203_v0 = vld [vmem:[#allocation5 + $0x8] sm:$0x3]  ;;  %v202_v1 = vld [vmem:[#allocation5] sm:$0xff] }
  0x2d   :  { %vm208_vm1 = vcmask 80896   ;;  %994 = vmatpush.msk.msra.mxu2 %vm212_vm0, %v203_v0  ;;  %v1467_v2 = vld [vmem:[#allocation2] sm:$0x3]  ;;  %v364_v3 = vld [vmem:[#allocation10 + $0x78] sm:$0xff]  ;;  %v363_v4 = vld [vmem:[#allocation10 + $0x70] sm:$0xff]  ;;  %s979_s22 = sshll.u32 %s1569_s15, 4  ;;  %s980_s22 = int_to_ptr.hbm [resolvable:$true] %s979_s22 }
  0x2e   :  { %369 = vmatpush.msra.mxu3 %v364_v3  ;;  %v362_v5 = vld [vmem:[#allocation10 + $0x68] sm:$0xff]  ;;  %v361_v6 = vld [vmem:[#allocation10 + $0x60] sm:$0xff]  ;;  %v360_v7 = vld [vmem:[#allocation10 + $0x58] sm:$0xff] }
  0x2f   :  { %231 = vmatpush.msra.mxu2 %v202_v1  ;;  %v359_v8 = vld [vmem:[#allocation10 + $0x50] sm:$0xff]  ;;  %v358_v9 = vld [vmem:[#allocation10 + $0x48] sm:$0xff]  ;;  %v357_v10 = vld [vmem:[#allocation10 + $0x40] sm:$0xff] }
  0x30   :  { %995 = vmatmul.msk.f32.vlgmr.msra.gmra.mxu2 %vm208_vm1, %v1467_v2  ;;  %370 = vmatpush.msra.mxu3 %v363_v4  ;;  %v356_v11 = vld [vmem:[#allocation10 + $0x38] sm:$0xff]  ;;  %v355_v12 = vld [vmem:[#allocation10 + $0x30] sm:$0xff]  ;;  %v354_v13 = vld [vmem:[#allocation10 + $0x28] sm:$0xff] }
  0x31   :  { %v353_v14 = vld [vmem:[#allocation10 + $0x20] sm:$0xff]  ;;  %v352_v15 = vld [vmem:[#allocation10 + $0x18] sm:$0xff]  ;;  %v351_v16 = vld [vmem:[#allocation10 + $0x10] sm:$0xff] }
  0x32   :  { %371 = vmatpush.msra.mxu3 %v362_v5  ;;  %v350_v17 = vld [vmem:[#allocation10 + $0x8] sm:$0xff]  ;;  %v349_v18 = vld [vmem:[#allocation10] sm:$0xff]  ;;  %v1020_v19 = vld [vmem:[#allocation7] ss:$0 sm:$0xff] }
  0x33   :  { %v257_v20 = vld [vmem:[#allocation8 + $0x10] sm:$0x3]  ;;  %v255_v21 = vld [vmem:[#allocation8] sm:$0xff]  ;;  %v420_v23 = vld [vmem:[#allocation13 + $0xf0] sm:$0xff] }
  0x34   :  { %372 = vmatpush.msra.mxu3 %v361_v6  ;;  %997 = vmatpush.msk.msrb.mxu2 %vm212_vm0, %v257_v20  ;;  %v421_v24 = vld [vmem:[#allocation13 + $0xf8] sm:$0xff]  ;;  %v258_v26 = vld [vmem:[#allocation8 + $0x18] sm:$0x3]  ;;  %v418_v27 = vld [vmem:[#allocation13 + $0xe0] sm:$0xff] }
  0x35   :  { %428 = vmatpush.msra.mxu0 %v420_v23  ;;  %448 = vmatpush.msra.mxu1 %v421_v24  ;;  %v419_v28 = vld [vmem:[#allocation13 + $0xe8] sm:$0xff]  ;;  %v416_v29 = vld [vmem:[#allocation13 + $0xd0] sm:$0xff]  ;;  %v417_v32 = vld [vmem:[#allocation13 + $0xd8] sm:$0xff] }
  0x36   :  { %373 = vmatpush.msra.mxu3 %v360_v7  ;;  %286 = vmatpush.msrb.mxu2 %v255_v21  ;;  %v256_v31 = vld [vmem:[#allocation8 + $0x8] sm:$0xff]  ;;  %v412_v35 = vld [vmem:[#allocation13 + $0xb0] sm:$0xff]  ;;  %v413_v36 = vld [vmem:[#allocation13 + $0xb8] sm:$0xff] }
  0x37   :  { %429 = vmatpush.msra.mxu0 %v418_v27  ;;  %449 = vmatpush.msra.mxu1 %v419_v28  ;;  %v414_v33 = vld [vmem:[#allocation13 + $0xc0] sm:$0xff]  ;;  %v415_v34 = vld [vmem:[#allocation13 + $0xc8] sm:$0xff]  ;;  %v408_v39 = vld [vmem:[#allocation13 + $0x90] sm:$0xff] }
  0x38   :  { %374 = vmatpush.msra.mxu3 %v359_v8  ;;  %998 = vmatmul.msk.f32.vlgmr.msrb.gmra.mxu2 %vm208_vm1, %v1467_v2  ;;  %v410_v37 = vld [vmem:[#allocation13 + $0xa0] sm:$0xff]  ;;  %v411_v38 = vld [vmem:[#allocation13 + $0xa8] sm:$0xff]  ;;  %v409_v41 = vld [vmem:[#allocation13 + $0x98] sm:$0xff] }
  0x39   :  { %999 = vmatpush.msk.msra.mxu2 %vm212_vm0, %v258_v26  ;;  %430 = vmatpush.msra.mxu0 %v416_v29  ;;  %v406_v43 = vld [vmem:[#allocation13 + $0x80] sm:$0xff]  ;;  %v407_v44 = vld [vmem:[#allocation13 + $0x88] sm:$0xff]  ;;  %v404_v45 = vld [vmem:[#allocation13 + $0x70] sm:$0xff] }
  0x3a   :  { %375 = vmatpush.msra.mxu3 %v358_v9  ;;  %450 = vmatpush.msra.mxu1 %v417_v32  ;;  %v405_v46 = vld [vmem:[#allocation13 + $0x78] sm:$0xff]  ;;  %v402_v47 = vld [vmem:[#allocation13 + $0x60] sm:$0xff]  ;;  %v403_v48 = vld [vmem:[#allocation13 + $0x68] sm:$0xff] }
  0x3b   :  { %306 = vmatpush.msra.mxu2 %v256_v31  ;;  %431 = vmatpush.msra.mxu0 %v414_v33  ;;  %v400_v49 = vld [vmem:[#allocation13 + $0x50] sm:$0xff]  ;;  %v401_v50 = vld [vmem:[#allocation13 + $0x58] sm:$0xff]  ;;  %v398_v52 = vld [vmem:[#allocation13 + $0x40] sm:$0xff] }
  0x3c   :  { %376 = vmatpush.msra.mxu3 %v357_v10  ;;  %451 = vmatpush.msra.mxu1 %v415_v34  ;;  %v399_v54 = vld [vmem:[#allocation13 + $0x48] sm:$0xff]  ;;  %v396_v55 = vld [vmem:[#allocation13 + $0x30] sm:$0xff]  ;;  %v397_v57 = vld [vmem:[#allocation13 + $0x38] sm:$0xff] }
  0x3d   :  { %432 = vmatpush.msra.mxu0 %v412_v35  ;;  %v394_v1 = vld [vmem:[#allocation13 + $0x20] sm:$0xff]  ;;  %v392_v3 = vld [vmem:[#allocation13 + $0x10] sm:$0xff]  ;;  %v393_v4 = vld [vmem:[#allocation13 + $0x18] sm:$0xff] }
  0x3e   :  { %377 = vmatpush.msra.mxu3 %v356_v11  ;;  %452 = vmatpush.msra.mxu1 %v413_v36  ;;  %v390_v5 = vld [vmem:[#allocation13] sm:$0xff]  ;;  %v391_v6 = vld [vmem:[#allocation13 + $0x8] sm:$0xff]  ;;  %v502_v7 = vld [vmem:[#allocation14 + $0xf0] sm:$0xff] }
  0x3f   :  { %433 = vmatpush.msra.mxu0 %v410_v37  ;;  %v534_v8 = vld [vmem:[#allocation14 + $0x1f0] sm:$0xff]  ;;  %542 = vmatpush.msrb.mxu2 %v502_v7  ;;  %v503_v9 = vld [vmem:[#allocation14 + $0xf8] sm:$0xff]  ;;  %v500_v11 = vld [vmem:[#allocation14 + $0xe0] sm:$0xff] }
  0x40   :  { %378 = vmatpush.msra.mxu3 %v355_v12  ;;  %1000 = vmatmul.msk.f32.vlgmr.msra.gmra.mxu2 %vm208_vm1, %v1467_v2  ;;  %v395_v2 = vld [vmem:[#allocation13 + $0x28] sm:$0xff]  ;;  %v535_v10 = vld [vmem:[#allocation14 + $0x1f8] sm:$0xff]  ;;  %v532_v12 = vld [vmem:[#allocation14 + $0x1e0] sm:$0xff] }
  0x41   :  { %453 = vmatpush.msra.mxu1 %v411_v38  ;;  %434 = vmatpush.msra.mxu0 %v408_v39  ;;  %v528_v20 = vld [vmem:[#allocation14 + $0x1c0] sm:$0xff]  ;;  %v497_v21 = vld [vmem:[#allocation14 + $0xc8] sm:$0xff]  ;;  %v494_v23 = vld [vmem:[#allocation14 + $0xb0] sm:$0xff] }
  0x42   :  { %379 = vmatpush.msra.mxu3 %v354_v13  ;;  %v501_v13 = vld [vmem:[#allocation14 + $0xe8] sm:$0xff]  ;;  %543 = vmatpush.msrb.mxu2 %v500_v11  ;;  %v526_v24 = vld [vmem:[#allocation14 + $0x1b0] sm:$0xff]  ;;  %v527_v26 = vld [vmem:[#allocation14 + $0x1b8] sm:$0xff] }
  0x43   :  { %454 = vmatpush.msra.mxu1 %v409_v41  ;;  %435 = vmatpush.msra.mxu0 %v406_v43  ;;  %v492_v27 = vld [vmem:[#allocation14 + $0xa0] sm:$0xff]  ;;  %v493_v29 = vld [vmem:[#allocation14 + $0xa8] sm:$0xff]  ;;  %v490_v31 = vld [vmem:[#allocation14 + $0x90] sm:$0xff] }
  0x44   :  { %380 = vmatpush.msra.mxu3 %v353_v14  ;;  %v533_v14 = vld [vmem:[#allocation14 + $0x1e8] sm:$0xff]  ;;  %v524_v28 = vld [vmem:[#allocation14 + $0x1a0] sm:$0xff]  ;;  %v522_v32 = vld [vmem:[#allocation14 + $0x190] sm:$0xff] }
  0x45   :  { %455 = vmatpush.msra.mxu1 %v407_v44  ;;  %436 = vmatpush.msra.mxu0 %v404_v45  ;;  %v491_v33 = vld [vmem:[#allocation14 + $0x98] sm:$0xff]  ;;  %v488_v35 = vld [vmem:[#allocation14 + $0x80] sm:$0xff]  ;;  %v489_v37 = vld [vmem:[#allocation14 + $0x88] sm:$0xff] }
  0x46   :  { %381 = vmatpush.msra.mxu3 %v352_v15  ;;  %v498_v15 = vld [vmem:[#allocation14 + $0xd0] sm:$0xff]  ;;  %v523_v34 = vld [vmem:[#allocation14 + $0x198] sm:$0xff]  ;;  %v520_v36 = vld [vmem:[#allocation14 + $0x180] sm:$0xff] }
  0x47   :  { %456 = vmatpush.msra.mxu1 %v405_v46  ;;  %437 = vmatpush.msra.mxu0 %v402_v47  ;;  %v521_v38 = vld [vmem:[#allocation14 + $0x188] sm:$0xff]  ;;  %v486_v39 = vld [vmem:[#allocation14 + $0x70] sm:$0xff]  ;;  %v487_v41 = vld [vmem:[#allocation14 + $0x78] sm:$0xff] }
  0x48   :  { %382 = vmatpush.msra.mxu3 %v351_v16  ;;  %v530_v16 = vld [vmem:[#allocation14 + $0x1d0] sm:$0xff]  ;;  %544 = vmatpush.msrb.mxu2 %v498_v15  ;;  %v484_v43 = vld [vmem:[#allocation14 + $0x60] sm:$0xff]  ;;  %v485_v45 = vld [vmem:[#allocation14 + $0x68] sm:$0xff] }
  0x49   :  { %457 = vmatpush.msra.mxu1 %v403_v48  ;;  %438 = vmatpush.msra.mxu0 %v400_v49  ;;  %v516_v44 = vld [vmem:[#allocation14 + $0x160] sm:$0xff]  ;;  %v517_v46 = vld [vmem:[#allocation14 + $0x168] sm:$0xff]  ;;  %v482_v47 = vld [vmem:[#allocation14 + $0x50] sm:$0xff] }
  0x4a   :  { %383 = vmatpush.msra.mxu3 %v350_v17  ;;  %v499_v17 = vld [vmem:[#allocation14 + $0xd8] sm:$0xff]  ;;  %v514_v48 = vld [vmem:[#allocation14 + $0x150] sm:$0xff]  ;;  %v508_v11 = vld [vmem:[#allocation14 + $0x120] sm:$0xff] }
  0x4b   :  { %458 = vmatpush.msra.mxu1 %v401_v50  ;;  %439 = vmatpush.msra.mxu0 %v398_v52  ;;  %v483_v49 = vld [vmem:[#allocation14 + $0x58] sm:$0xff]  ;;  %v512_v52 = vld [vmem:[#allocation14 + $0x140] sm:$0xff]  ;;  %v474_v15 = vld [vmem:[#allocation14 + $0x10] sm:$0xff] }
  0x4c   :  { %384 = vmatpush.msra.mxu3 %v349_v18  ;;  %v531_v18 = vld [vmem:[#allocation14 + $0x1d8] sm:$0xff] }
  0x4d   :  { %459 = vmatpush.msra.mxu1 %v399_v54  ;;  %440 = vmatpush.msra.mxu0 %v396_v55  ;;  %v515_v50 = vld [vmem:[#allocation14 + $0x158] sm:$0xff]  ;;  %v513_v54 = vld [vmem:[#allocation14 + $0x148] sm:$0xff] }
  0x4e   :  { %562 = vmatpush.msrb.mxu3 %v534_v8  ;;  %v1021_v55 = vld [vmem:[#allocation11] ss:$0 sm:$0xff] }
  0x4f   :  { %460 = vmatpush.msra.mxu1 %v397_v57  ;;  %441 = vmatpush.msra.mxu0 %v394_v1  ;;  %v511_v8 = vld [vmem:[#allocation14 + $0x138] sm:$0xff] }
  0x50   :  { %563 = vmatpush.msrb.mxu3 %v532_v12  ;;  %v477_v12 = vld [vmem:[#allocation14 + $0x28] sm:$0xff] }
  0x51   :  { %461 = vmatpush.msra.mxu1 %v395_v2  ;;  %442 = vmatpush.msra.mxu0 %v392_v3 }
  0x52   :  { %564 = vmatpush.msrb.mxu3 %v530_v16  ;;  %v506_v16 = vld [vmem:[#allocation14 + $0x110] sm:$0xff] }
  0x53   :  { %462 = vmatpush.msra.mxu1 %v393_v4  ;;  %443 = vmatpush.msra.mxu0 %v390_v5  ;;  %v478_v4 = vld [vmem:[#allocation14 + $0x30] sm:$0xff] }
  0x54   :  { %565 = vmatpush.msrb.mxu3 %v528_v20  ;;  %v510_v5 = vld [vmem:[#allocation14 + $0x130] sm:$0xff]  ;;  %v472_v20 = vld [vmem:[#allocation14] sm:$0xff] }
  0x55   :  { %463 = vmatpush.msra.mxu1 %v391_v6  ;;  %582 = vmatpush.msrb.mxu0 %v503_v9  ;;  %v479_v6 = vld [vmem:[#allocation14 + $0x38] sm:$0xff] }
  0x56   :  { %566 = vmatpush.msrb.mxu3 %v526_v24  ;;  %v686_v24 = vld [vmem:[#allocation16 + $0x1f0] sm:$0xff] }
  0x57   :  { %602 = vmatpush.msrb.mxu1 %v535_v10  ;;  %583 = vmatpush.msrb.mxu0 %v501_v13  ;;  %v476_v10 = vld [vmem:[#allocation14 + $0x20] sm:$0xff]  ;;  %v509_v13 = vld [vmem:[#allocation14 + $0x128] sm:$0xff] }
  0x58   :  { %567 = vmatpush.msrb.mxu3 %v524_v28  ;;  %v682_v28 = vld [vmem:[#allocation16 + $0x1d0] sm:$0xff] }
  0x59   :  { %603 = vmatpush.msrb.mxu1 %v533_v14  ;;  %584 = vmatpush.msrb.mxu0 %v499_v17  ;;  %v475_v17 = vld [vmem:[#allocation14 + $0x18] sm:$0xff] }
  0x5a   :  { %568 = vmatpush.msrb.mxu3 %v522_v32  ;;  %v652_v32 = vld [vmem:[#allocation16 + $0xe0] sm:$0xff] }
  0x5b   :  { %604 = vmatpush.msrb.mxu1 %v531_v18  ;;  %585 = vmatpush.msrb.mxu0 %v497_v21  ;;  %v504_v21 = vld [vmem:[#allocation14 + $0x100] sm:$0xff] }
  0x5c   :  { %569 = vmatpush.msrb.mxu3 %v520_v36 }
  0xb3   :  { %v233_v22 = vpop.f32.mrf.mxu2 }
  0xb4   :  { %v234_v25 = vadd.f32 %v1020_v19, %v233_v22  ;;  %v496_v19 = vld [vmem:[#allocation14 + $0xc0] sm:$0xff]  ;;  %v529_v22 = vld [vmem:[#allocation14 + $0x1c8] sm:$0xff] }
  0xb5   :  { %545 = vmatpush.msrb.mxu2 %v496_v19  ;;  %605 = vmatpush.msrb.mxu1 %v529_v22  ;;  %v507_v19 = vld [vmem:[#allocation14 + $0x118] sm:$0xff]  ;;  %v473_v22 = vld [vmem:[#allocation14 + $0x8] sm:$0xff] }
  0xb6   :  { %v996_v30 = vmul.f32 -1.442695, %v234_v25  ;;  %v495_v25 = vld [vmem:[#allocation14 + $0xb8] sm:$0xff] }
  0xb7   :  { %546 = vmatpush.msrb.mxu2 %v494_v23  ;;  %586 = vmatpush.msrb.mxu0 %v495_v25  ;;  %v505_v23 = vld [vmem:[#allocation14 + $0x108] sm:$0xff]  ;;  %v687_v25 = vld [vmem:[#allocation16 + $0x1f8] sm:$0xff] }
  0xb8   :  { %1022 = vpow2.f32 %v996_v30  ;;  %v525_v30 = vld [vmem:[#allocation14 + $0x1a8] sm:$0xff]  ;;  %606 = vmatpush.msrb.mxu1 %v527_v26  ;;  %v684_v26 = vld [vmem:[#allocation16 + $0x1e0] sm:$0xff] }
  0xb9   :  { %547 = vmatpush.msrb.mxu2 %v492_v27  ;;  %587 = vmatpush.msrb.mxu0 %v493_v29  ;;  %v685_v27 = vld [vmem:[#allocation16 + $0x1e8] sm:$0xff]  ;;  %v683_v29 = vld [vmem:[#allocation16 + $0x1d8] sm:$0xff] }
  0xba   :  { %607 = vmatpush.msrb.mxu1 %v525_v30  ;;  %v654_v30 = vld [vmem:[#allocation16 + $0xf0] sm:$0xff] }
  0xbb   :  { %548 = vmatpush.msrb.mxu2 %v490_v31  ;;  %588 = vmatpush.msrb.mxu0 %v491_v33  ;;  %v655_v31 = vld [vmem:[#allocation16 + $0xf8] sm:$0xff]  ;;  %v680_v33 = vld [vmem:[#allocation16 + $0x1c0] sm:$0xff] }
  0xbc   :  { %608 = vmatpush.msrb.mxu1 %v523_v34  ;;  %v681_v34 = vld [vmem:[#allocation16 + $0x1c8] sm:$0xff] }
  0xbd   :  { %549 = vmatpush.msrb.mxu2 %v488_v35  ;;  %589 = vmatpush.msrb.mxu0 %v489_v37  ;;  %v653_v35 = vld [vmem:[#allocation16 + $0xe8] sm:$0xff]  ;;  %v650_v37 = vld [vmem:[#allocation16 + $0xd0] sm:$0xff] }
  0xbe   :  { %v1023_v40 = vpop.eup %1022  ;;  %609 = vmatpush.msrb.mxu1 %v521_v38  ;;  %v651_v38 = vld [vmem:[#allocation16 + $0xd8] sm:$0xff] }
  0xbf   :  { %v239_v42 = vadd.f32 1.0, %v1023_v40  ;;  %v518_v40 = vld [vmem:[#allocation14 + $0x170] sm:$0xff]  ;;  %550 = vmatpush.msrb.mxu2 %v486_v39  ;;  %590 = vmatpush.msrb.mxu0 %v487_v41  ;;  %v679_v41 = vld [vmem:[#allocation16 + $0x1b8] sm:$0xff] }
  0xc0   :  { %570 = vmatpush.msrb.mxu3 %v518_v40  ;;  %v678_v40 = vld [vmem:[#allocation16 + $0x1b0] sm:$0xff] }
  0xc1   :  { %1024 = vrcp.f32 %v239_v42  ;;  %v251_v58 = vand.u32 2147483648, %v239_v42  ;;  %v249_v60 = vand.u32 2147483647, %v239_v42  ;;  %vm245_vm3 = vweird.f32 %v239_v42  ;;  %551 = vmatpush.msrb.mxu2 %v484_v43  ;;  %591 = vmatpush.msrb.mxu0 %v485_v45  ;;  %v649_v43 = vld [vmem:[#allocation16 + $0xc8] sm:$0xff]  ;;  %v676_v45 = vld [vmem:[#allocation16 + $0x1a0] sm:$0xff] }
  0xc2   :  { %571 = vmatpush.msrb.mxu3 %v516_v44 }
  0xc3   :  { %v252_v62 = vor.u32 1.1754944e-38, %v251_v58  ;;  %vm250_vm5 = vcmp.eq.f32.partialorder %v249_v60, 8.507059e+37  ;;  %552 = vmatpush.msrb.mxu2 %v482_v47  ;;  %592 = vmatpush.msrb.mxu0 %v483_v49  ;;  %v259_v60 = vld [vmem:[%s1558_s4] sm:$0x3]  ;;  %v647_v49 = vld [vmem:[#allocation16 + $0xb8] sm:$0xff] }
  0xc4   :  { %572 = vmatpush.msrb.mxu3 %v514_v48  ;;  %v646_v48 = vld [vmem:[#allocation16 + $0xb0] sm:$0xff] }
  0xc6   :  { %573 = vmatpush.msrb.mxu3 %v512_v52  ;;  %v644_v52 = vld [vmem:[#allocation16 + $0xa0] sm:$0xff] }
  0xc7   :  { %v1025_v51 = vpop.eup %1024 }
  0xc8   :  { %v241_v53 = vmul.f32 %v1025_v51, %v239_v42  ;;  %vm246_vm2 = vweird.f32 %v1025_v51  ;;  %v519_v42 = vld [vmem:[#allocation14 + $0x178] sm:$0xff]  ;;  %574 = vmatpush.msrb.mxu3 %v510_v5 }
  0xc9   :  { %vm247_vm4 = vmor %vm245_vm3, %vm246_vm2  ;;  %610 = vmatpush.msrb.mxu1 %v519_v42  ;;  %v648_v42 = vld [vmem:[#allocation16 + $0xc0] sm:$0xff]  ;;  %v639_v5 = vld [vmem:[#allocation16 + $0x78] sm:$0xff] }
  0xca   :  { %v242_v56 = vsub.f32 1.0, %v241_v53  ;;  %v481_v53 = vld [vmem:[#allocation14 + $0x48] sm:$0xff]  ;;  %575 = vmatpush.msrb.mxu3 %v508_v11 }
  0xcb   :  { %611 = vmatpush.msrb.mxu1 %v517_v46  ;;  %593 = vmatpush.msrb.mxu0 %v481_v53  ;;  %v677_v46 = vld [vmem:[#allocation16 + $0x1a8] sm:$0xff] }
  0xcc   :  { %v243_v59 = vmul.f32 %v1025_v51, %v242_v56  ;;  %576 = vmatpush.msrb.mxu3 %v506_v16  ;;  %v645_v53 = vld [vmem:[#allocation16 + $0xa8] sm:$0xff]  ;;  %v828_v16 = vld [vmem:[#allocation17 + $0x190] sm:$0xff] }
  0xcd   :  { %612 = vmatpush.msrb.mxu1 %v515_v50  ;;  %594 = vmatpush.msrb.mxu0 %v479_v6  ;;  %v674_v50 = vld [vmem:[#allocation16 + $0x190] sm:$0xff]  ;;  %v422_v6 = vld [vmem:[%s1562_s8] sm:$0x3] }
  0xce   :  { %v244_v61 = vadd.f32 %v1025_v51, %v243_v59  ;;  %v288_v59 = vpop.f32.mrf.mxu2  ;;  %577 = vmatpush.msrb.mxu3 %v504_v21  ;;  %v425_v21 = vperm.slane %v422_v6, 1 }
  0xcf   :  { %613 = vmatpush.msrb.mxu1 %v513_v54  ;;  %595 = vmatpush.msrb.mxu0 %v477_v12 }
  0xd0   :  { %v248_v63 = vsel %vm247_vm4, %v1025_v51, %v244_v61  ;;  %v480_v51 = vld [vmem:[#allocation14 + $0x40] sm:$0xff]  ;;  %v261_v61 = vperm.slane %v259_v60, 0 }
  0xd1   :  { %v253_v0 = vsel %vm250_vm5, %v252_v62, %v248_v63  ;;  %553 = vmatpush.msrb.mxu2 %v480_v51  ;;  %v262_v62 = vperm.slane %v259_v60, 1  ;;  %614 = vmatpush.msrb.mxu1 %v511_v8  ;;  %v675_v51 = vld [vmem:[#allocation16 + $0x198] sm:$0xff]  ;;  %v670_v60 = vld [vmem:[#allocation16 + $0x170] sm:$0xff] }
  0xd2   :  { %385 = vmatmul.f32.vlgmr.msra.gmra.mxu3 %v253_v0  ;;  %v289_v0 = vadd.f32 %v288_v59, %v261_v61  ;;  %596 = vmatpush.msrb.mxu0 %v475_v17  ;;  %v643_v59 = vld [vmem:[#allocation16 + $0x98] sm:$0xff]  ;;  %v424_v17 = vperm.slane %v422_v6, 0 }
  0xd3   :  { %554 = vmatpush.msrb.mxu2 %v478_v4  ;;  %615 = vmatpush.msrb.mxu1 %v509_v13  ;;  %v671_v61 = vld [vmem:[#allocation16 + $0x178] sm:$0xff]  ;;  %v638_v4 = vld [vmem:[#allocation16 + $0x70] sm:$0xff]  ;;  %v664_v13 = vld [vmem:[#allocation16 + $0x140] sm:$0xff] }
  0xd4   :  { %v1001_v2 = vmul.f32 -1.442695, %v289_v0  ;;  %597 = vmatpush.msrb.mxu0 %v473_v22  ;;  %714 = vmatpush.msra.mxu3 %v686_v24  ;;  %v667_v8 = vld [vmem:[#allocation16 + $0x158] sm:$0xff] }
  0xd5   :  { %555 = vmatpush.msrb.mxu2 %v476_v10  ;;  %616 = vmatpush.msrb.mxu1 %v507_v19  ;;  %v805_v6 = vld [vmem:[#allocation17 + $0xd8] sm:$0xff] }
  0xd6   :  { %v308_v63 = vpop.f32.mrf.mxu2  ;;  %1026 = vpow2.f32 %v1001_v2  ;;  %715 = vmatpush.msra.mxu3 %v684_v26  ;;  %v669_v2 = vld [vmem:[#allocation16 + $0x168] sm:$0xff] }
  0xd7   :  { %v309_v1 = vadd.f32 %v308_v63, %v262_v62  ;;  %556 = vmatpush.msrb.mxu2 %v474_v15  ;;  %617 = vmatpush.msrb.mxu1 %v505_v23  ;;  %v640_v62 = vld [vmem:[#allocation16 + $0x80] sm:$0xff]  ;;  %v641_v63 = vld [vmem:[#allocation16 + $0x88] sm:$0xff] }
  0xd8   :  { %716 = vmatpush.msra.mxu3 %v682_v28  ;;  %v665_v15 = vld [vmem:[#allocation16 + $0x148] sm:$0xff] }
  0xd9   :  { %v1002_v3 = vmul.f32 -1.442695, %v309_v1  ;;  %557 = vmatpush.msrb.mxu2 %v472_v20  ;;  %v668_v1 = vld [vmem:[#allocation16 + $0x160] sm:$0xff] }
  0xda   :  { %717 = vmatpush.msra.mxu3 %v680_v33 }
  0xdb   :  { %1028 = vpow2.f32 %v1002_v3  ;;  %694 = vmatpush.msra.mxu2 %v654_v30 }
  0xdc   :  { %v1027_v7 = vpop.eup %1026  ;;  %718 = vmatpush.msra.mxu3 %v678_v40  ;;  %v660_v40 = vld [vmem:[#allocation16 + $0x120] sm:$0xff] }
  0xdd   :  { %v1480_v14 = vadd.f32 1.0, %v1027_v7  ;;  %695 = vmatpush.msra.mxu2 %v652_v32  ;;  %v666_v7 = vld [vmem:[#allocation16 + $0x150] sm:$0xff] }
  0xde   :  { %719 = vmatpush.msra.mxu3 %v676_v45  ;;  %v633_v45 = vld [vmem:[#allocation16 + $0x48] sm:$0xff] }
  0xdf   :  { %1030 = vrcp.f32 %v1480_v14  ;;  %696 = vmatpush.msra.mxu2 %v650_v37  ;;  %vm324_vm6 = vweird.f32 %v1480_v14  ;;  %v328_v10 = vand.u32 2147483647, %v1480_v14  ;;  %v330_v11 = vand.u32 2147483648, %v1480_v14  ;;  %v637_v37 = vld [vmem:[#allocation16 + $0x68] sm:$0xff] }
  0xe0   :  { %720 = vmatpush.msra.mxu3 %v674_v50  ;;  %v657_v50 = vld [vmem:[#allocation16 + $0x108] sm:$0xff] }
  0xe1   :  { %v1029_v9 = vpop.eup %1028  ;;  %697 = vmatpush.msra.mxu2 %v648_v42  ;;  %vm329_vm12 = vcmp.eq.f32.partialorder %v328_v10, 8.507059e+37  ;;  %v331_v23 = vor.u32 1.1754944e-38, %v330_v11  ;;  %v661_v42 = vld [vmem:[#allocation16 + $0x128] sm:$0xff]  ;;  %v830_v11 = vld [vmem:[#allocation17 + $0x1a0] sm:$0xff] }
  0xe2   :  { %v1482_v18 = vadd.f32 1.0, %v1029_v9  ;;  %v803_v10 = vld [vmem:[#allocation17 + $0xc8] sm:$0xff] }
  0xe3   :  { %698 = vmatpush.msra.mxu2 %v646_v48  ;;  %v656_v48 = vld [vmem:[#allocation16 + $0x100] sm:$0xff] }
  0xe4   :  { %1032 = vrcp.f32 %v1482_v18  ;;  %vm339_vm8 = vweird.f32 %v1482_v18  ;;  %v345_v12 = vand.u32 2147483648, %v1482_v18  ;;  %v343_v20 = vand.u32 2147483647, %v1482_v18 }
  0xe5   :  { %v1486_v36 = vpop.eup %1030  ;;  %699 = vmatpush.msra.mxu2 %v644_v52  ;;  %v629_v52 = vld [vmem:[#allocation16 + $0x28] sm:$0xff] }
  0xe6   :  { %v320_v44 = vmul.f32 %v1486_v36, %v1480_v14  ;;  %vm325_vm7 = vweird.f32 %v1486_v36  ;;  %vm344_vm13 = vcmp.eq.f32.partialorder %v343_v20, 8.507059e+37  ;;  %v827_v20 = vld [vmem:[#allocation17 + $0x188] sm:$0xff] }
  0xe7   :  { %vm1511_vm10 = vmor %vm324_vm6, %vm325_vm7 }
  0xe8   :  { %v321_v54 = vsub.f32 1.0, %v320_v44  ;;  %v658_v44 = vld [vmem:[#allocation16 + $0x110] sm:$0xff] }
  0xea   :  { %v1488_v39 = vpop.eup %1032  ;;  %v322_v0 = vmul.f32 %v1486_v36, %v321_v54  ;;  %v627_v54 = vld [vmem:[#allocation16 + $0x18] sm:$0xff] }
  0xeb   :  { %v335_v47 = vmul.f32 %v1488_v39, %v1482_v18  ;;  %vm340_vm9 = vweird.f32 %v1488_v39 }
  0xec   :  { %v323_v9 = vadd.f32 %v1486_v36, %v322_v0  ;;  %vm1521_vm11 = vmor %vm339_vm8, %vm340_vm9  ;;  %v837_v0 = vld [vmem:[#allocation17 + $0x1d8] sm:$0xff] }
  0xee   :  { %v327_v14 = vsel %vm1511_vm10, %v1486_v36, %v323_v9  ;;  %v662_v36 = vld [vmem:[#allocation16 + $0x130] sm:$0xff]  ;;  %v833_v9 = vld [vmem:[#allocation17 + $0x1b8] sm:$0xff] }
 0x155   :  { %v386_v56 = vpop.f32.mrf.mxu3 }
 0x156   :  { %v387_v57 = vadd.f32 %v1021_v55, %v386_v56  ;;  %v672_v55 = vld [vmem:[#allocation16 + $0x180] sm:$0xff]  ;;  %v673_v56 = vld [vmem:[#allocation16 + $0x188] sm:$0xff] }
 0x157   :  { %721 = vmatpush.msra.mxu3 %v672_v55  ;;  %v624_v55 = vld [vmem:[#allocation16] sm:$0xff] }
 0x158   :  { %v389_v58 = vmax.f32 %v387_v57, 0.0  ;;  %v336_v57 = vsub.f32 1.0, %v335_v47  ;;  %v630_v47 = vld [vmem:[#allocation16 + $0x30] sm:$0xff] }
 0x159   :  { %722 = vmatpush.msra.mxu3 %v670_v60  ;;  %v839_v60 = vld [vmem:[#allocation17 + $0x1e8] sm:$0xff] }
 0x15a   :  { %444 = vmatmul.f32.vlgmr.msra.gmra.mxu0 %v389_v58  ;;  %464 = vmatmul.f32.vlgmr.msra.gmra.mxu1 %v389_v58  ;;  %v642_v58 = vld [vmem:[#allocation16 + $0x90] sm:$0xff]  ;;  %v337_v3 = vmul.f32 %v1488_v39, %v336_v57 }
 0x15b   :  { %754 = vmatpush.msra.mxu1 %v687_v25  ;;  %734 = vmatpush.msra.mxu0 %v655_v31  ;;  %v346_v25 = vor.u32 1.1754944e-38, %v345_v12  ;;  %v332_v31 = vsel %vm329_vm12, %v331_v23, %v327_v14  ;;  %v840_v57 = vld [vmem:[#allocation17 + $0x1f0] sm:$0xff] }
 0x15c   :  { %700 = vmatpush.msra.mxu2 %v642_v58  ;;  %723 = vmatpush.msra.mxu3 %v668_v1  ;;  %v338_v19 = vadd.f32 %v1488_v39, %v337_v3  ;;  %v841_v58 = vld [vmem:[#allocation17 + $0x1f8] sm:$0xff]  ;;  %v806_v1 = vld [vmem:[#allocation17 + $0xe0] sm:$0xff]  ;;  %v807_v3 = vld [vmem:[#allocation17 + $0xe8] sm:$0xff] }
 0x15d   :  { %755 = vmatpush.msra.mxu1 %v685_v27  ;;  %735 = vmatpush.msra.mxu0 %v653_v35  ;;  %v636_v35 = vld [vmem:[#allocation16 + $0x60] sm:$0xff]  ;;  %v800_v12 = vld [vmem:[#allocation17 + $0xb0] sm:$0xff] }
 0x15e   :  { %701 = vmatpush.msra.mxu2 %v640_v62  ;;  %724 = vmatpush.msra.mxu3 %v666_v7  ;;  %v342_v18 = vsel %vm1521_vm11, %v1488_v39, %v338_v19  ;;  %v634_v39 = vld [vmem:[#allocation16 + $0x50] sm:$0xff]  ;;  %v826_v19 = vld [vmem:[#allocation17 + $0x180] sm:$0xff] }
 0x15f   :  { %756 = vmatpush.msra.mxu1 %v683_v29  ;;  %736 = vmatpush.msra.mxu0 %v651_v38  ;;  %v347_v32 = vsel %vm344_vm13, %v346_v25, %v342_v18  ;;  %v663_v38 = vld [vmem:[#allocation16 + $0x138] sm:$0xff]  ;;  %v808_v62 = vld [vmem:[#allocation17 + $0xf0] sm:$0xff] }
 0x160   :  { %702 = vmatpush.msra.mxu2 %v638_v4  ;;  %725 = vmatpush.msra.mxu3 %v664_v13  ;;  %v804_v4 = vld [vmem:[#allocation17 + $0xd0] sm:$0xff]  ;;  %v831_v13 = vld [vmem:[#allocation17 + $0x1a8] sm:$0xff] }
 0x161   :  { %757 = vmatpush.msra.mxu1 %v681_v34  ;;  %737 = vmatpush.msra.mxu0 %v649_v43  ;;  %v632_v43 = vld [vmem:[#allocation16 + $0x40] sm:$0xff]  ;;  %v832_v7 = vld [vmem:[#allocation17 + $0x1b0] sm:$0xff] }
 0x162   :  { %703 = vmatpush.msra.mxu2 %v636_v35  ;;  %726 = vmatpush.msra.mxu3 %v662_v36  ;;  %v824_v35 = vld [vmem:[#allocation17 + $0x170] sm:$0xff]  ;;  %v799_v36 = vld [vmem:[#allocation17 + $0xa8] sm:$0xff] }
 0x163   :  { %758 = vmatpush.msra.mxu1 %v679_v41  ;;  %738 = vmatpush.msra.mxu0 %v647_v49  ;;  %v635_v41 = vld [vmem:[#allocation16 + $0x58] sm:$0xff] }
 0x164   :  { %704 = vmatpush.msra.mxu2 %v634_v39  ;;  %727 = vmatpush.msra.mxu3 %v660_v40  ;;  %v631_v49 = vld [vmem:[#allocation16 + $0x38] sm:$0xff]  ;;  %v822_v39 = vld [vmem:[#allocation17 + $0x160] sm:$0xff] }
 0x165   :  { %759 = vmatpush.msra.mxu1 %v677_v46  ;;  %739 = vmatpush.msra.mxu0 %v645_v53  ;;  %v659_v46 = vld [vmem:[#allocation16 + $0x118] sm:$0xff]  ;;  %v626_v53 = vld [vmem:[#allocation16 + $0x10] sm:$0xff] }
 0x166   :  { %705 = vmatpush.msra.mxu2 %v632_v43  ;;  %728 = vmatpush.msra.mxu3 %v658_v44  ;;  %v797_v40 = vld [vmem:[#allocation17 + $0x98] sm:$0xff]  ;;  %v820_v43 = vld [vmem:[#allocation17 + $0x150] sm:$0xff]  ;;  %v795_v44 = vld [vmem:[#allocation17 + $0x88] sm:$0xff] }
 0x167   :  { %760 = vmatpush.msra.mxu1 %v675_v51  ;;  %740 = vmatpush.msra.mxu0 %v643_v59  ;;  %v628_v51 = vld [vmem:[#allocation16 + $0x20] sm:$0xff] }
 0x168   :  { %706 = vmatpush.msra.mxu2 %v630_v47  ;;  %729 = vmatpush.msra.mxu3 %v656_v48  ;;  %v838_v59 = vld [vmem:[#allocation17 + $0x1e0] sm:$0xff]  ;;  %v793_v48 = vld [vmem:[#allocation17 + $0x78] sm:$0xff] }
 0x169   :  { %761 = vmatpush.msra.mxu1 %v673_v56  ;;  %741 = vmatpush.msra.mxu0 %v641_v63  ;;  %v625_v56 = vld [vmem:[#allocation16 + $0x8] sm:$0xff]  ;;  %v809_v63 = vld [vmem:[#allocation17 + $0xf8] sm:$0xff]  ;;  %v818_v47 = vld [vmem:[#allocation17 + $0x140] sm:$0xff] }
 0x16a   :  { %707 = vmatpush.msra.mxu2 %v628_v51  ;;  %v816_v51 = vld [vmem:[#allocation17 + $0x130] sm:$0xff] }
 0x16b   :  { %762 = vmatpush.msra.mxu1 %v671_v61  ;;  %742 = vmatpush.msra.mxu0 %v639_v5  ;;  %v836_v61 = vld [vmem:[#allocation17 + $0x1d0] sm:$0xff]  ;;  %v835_v5 = vld [vmem:[#allocation17 + $0x1c8] sm:$0xff] }
 0x16c   :  { %708 = vmatpush.msra.mxu2 %v626_v53  ;;  %v817_v53 = vld [vmem:[#allocation17 + $0x138] sm:$0xff] }
 0x16d   :  { %763 = vmatpush.msra.mxu1 %v669_v2  ;;  %743 = vmatpush.msra.mxu0 %v637_v37  ;;  %v834_v2 = vld [vmem:[#allocation17 + $0x1c0] sm:$0xff]  ;;  %v825_v37 = vld [vmem:[#allocation17 + $0x178] sm:$0xff] }
 0x16e   :  { %709 = vmatpush.msra.mxu2 %v624_v55  ;;  %v814_v55 = vld [vmem:[#allocation17 + $0x120] sm:$0xff] }
 0x16f   :  { %764 = vmatpush.msra.mxu1 %v667_v8  ;;  %744 = vmatpush.msra.mxu0 %v635_v41  ;;  %v802_v8 = vld [vmem:[#allocation17 + $0xc0] sm:$0xff]  ;;  %v823_v41 = vld [vmem:[#allocation17 + $0x168] sm:$0xff] }
 0x171   :  { %765 = vmatpush.msra.mxu1 %v665_v15  ;;  %745 = vmatpush.msra.mxu0 %v633_v45  ;;  %v801_v15 = vld [vmem:[#allocation17 + $0xb8] sm:$0xff] }
 0x172   :  { %v821_v45 = vld [vmem:[#allocation17 + $0x158] sm:$0xff] }
 0x173   :  { %766 = vmatpush.msra.mxu1 %v663_v38  ;;  %746 = vmatpush.msra.mxu0 %v631_v49  ;;  %v796_v38 = vld [vmem:[#allocation17 + $0x90] sm:$0xff]  ;;  %v819_v49 = vld [vmem:[#allocation17 + $0x148] sm:$0xff] }
 0x175   :  { %767 = vmatpush.msra.mxu1 %v661_v42  ;;  %747 = vmatpush.msra.mxu0 %v629_v52  ;;  %v794_v42 = vld [vmem:[#allocation17 + $0x80] sm:$0xff]  ;;  %v791_v52 = vld [vmem:[#allocation17 + $0x68] sm:$0xff] }
 0x177   :  { %768 = vmatpush.msra.mxu1 %v659_v46  ;;  %748 = vmatpush.msra.mxu0 %v627_v54  ;;  %v792_v46 = vld [vmem:[#allocation17 + $0x70] sm:$0xff] }
 0x178   :  { %v788_v54 = vld [vmem:[#allocation17 + $0x50] sm:$0xff] }
 0x179   :  { %769 = vmatpush.msra.mxu1 %v657_v50  ;;  %749 = vmatpush.msra.mxu0 %v625_v56  ;;  %v790_v50 = vld [vmem:[#allocation17 + $0x60] sm:$0xff]  ;;  %v789_v56 = vld [vmem:[#allocation17 + $0x58] sm:$0xff] }
 0x1d7   :  { %v445_v24 = vpop.f32.mrf.mxu0  ;;  %v465_v26 = vpop.f32.mrf.mxu1 }
 0x1d8   :  { %v446_v27 = vadd.f32 %v445_v24, %v424_v17  ;;  %v466_v28 = vadd.f32 %v465_v26, %v425_v21  ;;  %v829_v17 = vld [vmem:[#allocation17 + $0x198] sm:$0xff]  ;;  %v536_v21 = vld [vmem:[%s1564_s10] sm:$0x3] }
 0x1d9   :  { %v539_v22 = vperm.slane %v536_v21, 1  ;;  %v538_v25 = vperm.slane %v536_v21, 0 }
 0x1da   :  { %v468_v29 = vmax.f32 %v446_v27, 0.0  ;;  %v469_v30 = vmax.f32 %v466_v28, 0.0 }
 0x1dc   :  { %v1531_v33 = vadd.f32 %v468_v29, %v332_v31  ;;  %v1533_v34 = vadd.f32 %v469_v30, %v347_v32  ;;  %v798_v32 = vld [vmem:[#allocation17 + $0xa0] sm:$0xff] }
 0x1de   :  { %558 = vmatmul.f32.vlgmr.msrb.gmra.mxu2 %v1531_v33  ;;  %578 = vmatmul.f32.vlgmr.msrb.gmra.mxu3 %v1533_v34 }
 0x1df   :  { %598 = vmatmul.f32.vlgmr.msrb.gmra.mxu0 %v1531_v33  ;;  %618 = vmatmul.f32.vlgmr.msrb.gmra.mxu1 %v1533_v34 }
 0x1e0   :  { %868 = vmatpush.msrb.mxu3 %v840_v57  ;;  %908 = vmatpush.msrb.mxu1 %v841_v58  ;;  %v815_v57 = vld [vmem:[#allocation17 + $0x128] sm:$0xff]  ;;  %v786_v58 = vld [vmem:[#allocation17 + $0x40] sm:$0xff] }
 0x1e1   :  { %848 = vmatpush.msrb.mxu2 %v808_v62  ;;  %888 = vmatpush.msrb.mxu0 %v809_v63  ;;  %v784_v62 = vld [vmem:[#allocation17 + $0x30] sm:$0xff]  ;;  %v810_v63 = vld [vmem:[#allocation17 + $0x100] sm:$0xff] }
 0x1e2   :  { %869 = vmatpush.msrb.mxu3 %v838_v59  ;;  %909 = vmatpush.msrb.mxu1 %v839_v60  ;;  %v812_v59 = vld [vmem:[#allocation17 + $0x110] sm:$0xff]  ;;  %v787_v60 = vld [vmem:[#allocation17 + $0x48] sm:$0xff] }
 0x1e3   :  { %849 = vmatpush.msrb.mxu2 %v806_v1  ;;  %889 = vmatpush.msrb.mxu0 %v807_v3  ;;  %v811_v1 = vld [vmem:[#allocation17 + $0x108] sm:$0xff] }
 0x1e4   :  { %870 = vmatpush.msrb.mxu3 %v836_v61  ;;  %910 = vmatpush.msrb.mxu1 %v837_v0  ;;  %v813_v61 = vld [vmem:[#allocation17 + $0x118] sm:$0xff]  ;;  %v783_v3 = vld [vmem:[#allocation17 + $0x28] sm:$0xff] }
 0x1e5   :  { %850 = vmatpush.msrb.mxu2 %v804_v4  ;;  %890 = vmatpush.msrb.mxu0 %v805_v6  ;;  %v785_v0 = vld [vmem:[#allocation17 + $0x38] sm:$0xff]  ;;  %v780_v4 = vld [vmem:[#allocation17 + $0x10] sm:$0xff]  ;;  %v778_v6 = vld [vmem:[#allocation17] sm:$0xff] }
 0x1e6   :  { %871 = vmatpush.msrb.mxu3 %v834_v2  ;;  %911 = vmatpush.msrb.mxu1 %v835_v5  ;;  %v782_v2 = vld [vmem:[#allocation17 + $0x20] sm:$0xff]  ;;  %v781_v5 = vld [vmem:[#allocation17 + $0x18] sm:$0xff] }
 0x1e7   :  { %851 = vmatpush.msrb.mxu2 %v802_v8  ;;  %891 = vmatpush.msrb.mxu0 %v803_v10  ;;  %v688_v8 = vld [vmem:[%s1566_s12] sm:$0x3] }
 0x1e8   :  { %872 = vmatpush.msrb.mxu3 %v832_v7  ;;  %912 = vmatpush.msrb.mxu1 %v833_v9  ;;  %v779_v7 = vld [vmem:[#allocation17 + $0x8] sm:$0xff]  ;;  %v691_v9 = vperm.slane %v688_v8, 1 }
 0x1e9   :  { %852 = vmatpush.msrb.mxu2 %v800_v12  ;;  %892 = vmatpush.msrb.mxu0 %v801_v15  ;;  %v690_v15 = vperm.slane %v688_v8, 0 }
 0x1ea   :  { %873 = vmatpush.msrb.mxu3 %v830_v11  ;;  %913 = vmatpush.msrb.mxu1 %v831_v13 }
 0x1eb   :  { %853 = vmatpush.msrb.mxu2 %v798_v32  ;;  %893 = vmatpush.msrb.mxu0 %v799_v36 }
 0x1ec   :  { %874 = vmatpush.msrb.mxu3 %v828_v16  ;;  %914 = vmatpush.msrb.mxu1 %v829_v17 }
 0x1ed   :  { %854 = vmatpush.msrb.mxu2 %v796_v38  ;;  %894 = vmatpush.msrb.mxu0 %v797_v40 }
 0x1ee   :  { %875 = vmatpush.msrb.mxu3 %v826_v19  ;;  %915 = vmatpush.msrb.mxu1 %v827_v20 }
 0x1ef   :  { %855 = vmatpush.msrb.mxu2 %v794_v42  ;;  %895 = vmatpush.msrb.mxu0 %v795_v44 }
 0x1f0   :  { %876 = vmatpush.msrb.mxu3 %v824_v35  ;;  %916 = vmatpush.msrb.mxu1 %v825_v37 }
 0x1f1   :  { %856 = vmatpush.msrb.mxu2 %v792_v46  ;;  %896 = vmatpush.msrb.mxu0 %v793_v48 }
 0x1f2   :  { %877 = vmatpush.msrb.mxu3 %v822_v39  ;;  %917 = vmatpush.msrb.mxu1 %v823_v41 }
 0x1f3   :  { %857 = vmatpush.msrb.mxu2 %v790_v50  ;;  %897 = vmatpush.msrb.mxu0 %v791_v52 }
 0x1f4   :  { %878 = vmatpush.msrb.mxu3 %v820_v43  ;;  %918 = vmatpush.msrb.mxu1 %v821_v45 }
 0x1f5   :  { %858 = vmatpush.msrb.mxu2 %v788_v54  ;;  %898 = vmatpush.msrb.mxu0 %v789_v56 }
 0x1f6   :  { %879 = vmatpush.msrb.mxu3 %v818_v47  ;;  %919 = vmatpush.msrb.mxu1 %v819_v49 }
 0x1f7   :  { %859 = vmatpush.msrb.mxu2 %v786_v58  ;;  %899 = vmatpush.msrb.mxu0 %v787_v60 }
 0x1f8   :  { %880 = vmatpush.msrb.mxu3 %v816_v51  ;;  %920 = vmatpush.msrb.mxu1 %v817_v53 }
 0x1f9   :  { %860 = vmatpush.msrb.mxu2 %v784_v62  ;;  %900 = vmatpush.msrb.mxu0 %v785_v0 }
 0x1fa   :  { %881 = vmatpush.msrb.mxu3 %v814_v55  ;;  %921 = vmatpush.msrb.mxu1 %v815_v57 }
 0x1fb   :  { %861 = vmatpush.msrb.mxu2 %v782_v2  ;;  %901 = vmatpush.msrb.mxu0 %v783_v3 }
 0x1fc   :  { %882 = vmatpush.msrb.mxu3 %v812_v59  ;;  %922 = vmatpush.msrb.mxu1 %v813_v61 }
 0x1fd   :  { %862 = vmatpush.msrb.mxu2 %v780_v4  ;;  %902 = vmatpush.msrb.mxu0 %v781_v5 }
 0x1fe   :  { %883 = vmatpush.msrb.mxu3 %v810_v63  ;;  %923 = vmatpush.msrb.mxu1 %v811_v1 }
 0x1ff   :  { %863 = vmatpush.msrb.mxu2 %v778_v6  ;;  %903 = vmatpush.msrb.mxu0 %v779_v7 }
 0x25c   :  { %v599_v14 = vpop.f32.mrf.mxu0  ;;  %v619_v24 = vpop.f32.mrf.mxu1 }
 0x25d   :  { %v600_v23 = vadd.f32 %v599_v14, %v539_v22 }
 0x25f   :  { %v620_v26 = vadd.f32 %v619_v24, %v600_v23  ;;  %v842_v24 = vld [vmem:[%s1568_s14] sm:$0x3]  ;;  %s1334_s14 = smov [#allocation19]  }
 0x260   :  { %s977_s0 = sshll.u32 %s1334_s14, 4  ;;  %s978_s0 = int_to_ptr.vmem [resolvable:$true] %s977_s0 }
 0x261   :  { %v623_v27 = vmax.f32 %v620_v26, 0.0  ;;  %v559_v18 = vpop.f32.mrf.mxu2  ;;  %v579_v29 = vpop.f32.mrf.mxu3 }
 0x262   :  { %v560_v28 = vadd.f32 %v559_v18, %v538_v25  ;;  %v845_v25 = vperm.slane %v842_v24, 1 }
 0x263   :  { %730 = vmatmul.f32.vlgmr.msra.gmra.mxu3 %v623_v27  ;;  %770 = vmatmul.f32.vlgmr.msra.gmra.mxu1 %v623_v27 }
 0x264   :  { %v580_v30 = vadd.f32 %v579_v29, %v560_v28 }
 0x266   :  { %v622_v31 = vmax.f32 %v580_v30, 0.0 }
 0x268   :  { %710 = vmatmul.f32.vlgmr.msra.gmra.mxu2 %v622_v31  ;;  %750 = vmatmul.f32.vlgmr.msra.gmra.mxu0 %v622_v31 }
 0x2e0   :  { %v771_v12 = vpop.f32.mrf.mxu1 }
 0x2e5   :  { %v751_v10 = vpop.f32.mrf.mxu0 }
 0x2e6   :  { %v752_v11 = vadd.f32 %v751_v10, %v691_v9  ;;  %v731_v21 = vpop.f32.mrf.mxu3 }
 0x2e8   :  { %v772_v13 = vadd.f32 %v771_v12, %v752_v11 }
 0x2ea   :  { %v775_v16 = vmax.f32 %v772_v13, 0.0 }
 0x2eb   :  { %v711_v17 = vpop.f32.mrf.mxu2 }
 0x2ec   :  { %v777_v19 = vadd.f32 %v775_v16, %v1533_v34  ;;  %v712_v20 = vadd.f32 %v711_v17, %v690_v15  ;;  %v844_v34 = vperm.slane %v842_v24, 0 }
 0x2ee   :  { %v732_v22 = vadd.f32 %v731_v21, %v712_v20  ;;  %884 = vmatmul.f32.vlgmr.msrb.gmra.mxu3 %v777_v19  ;;  %924 = vmatmul.f32.vlgmr.msrb.gmra.mxu1 %v777_v19 }
 0x2f0   :  { %v774_v14 = vmax.f32 %v732_v22, 0.0 }
 0x2f2   :  { %v776_v23 = vadd.f32 %v774_v14, %v1531_v33 }
 0x2f4   :  { %864 = vmatmul.f32.vlgmr.msrb.gmra.mxu2 %v776_v23  ;;  %904 = vmatmul.f32.vlgmr.msrb.gmra.mxu0 %v776_v23 }
 0x36b   :  { %v925_v18 = vpop.f32.mrf.mxu1 }
 0x371   :  { %v905_v26 = vpop.f32.mrf.mxu0  ;;  %v885_v32 = vpop.f32.mrf.mxu3 }
 0x372   :  { %v906_v27 = vadd.f32 %v905_v26, %v845_v25 }
 0x374   :  { %v926_v28 = vadd.f32 %v925_v18, %v906_v27 }
 0x376   :  { %v1004_v29 = vmul.f32 -1.442695, %v926_v28 }
 0x377   :  { %v865_v30 = vpop.f32.mrf.mxu2 }
 0x378   :  { %1034 = vpow2.f32 %v1004_v29  ;;  %v866_v31 = vadd.f32 %v865_v30, %v844_v34 }
 0x37a   :  { %v886_v35 = vadd.f32 %v885_v32, %v866_v31 }
 0x37c   :  { %v1003_v36 = vmul.f32 -1.442695, %v886_v35 }
 0x37e   :  { %v1035_v33 = vpop.eup %1034  ;;  %1036 = vpow2.f32 %v1003_v36 }
 0x37f   :  { %v935_v37 = vadd.f32 1.0, %v1035_v33 }
 0x381   :  { %1038 = vrcp.f32 %v935_v37  ;;  %v962_v45 = vand.u32 2147483648, %v935_v37  ;;  %vm956_vm15 = vweird.f32 %v935_v37  ;;  %v960_v48 = vand.u32 2147483647, %v935_v37 }
 0x383   :  { %v963_v52 = vor.u32 1.1754944e-38, %v962_v45  ;;  %vm961_vm3 = vcmp.eq.f32.partialorder %v960_v48, 8.507059e+37 }
 0x384   :  { %v1037_v38 = vpop.eup %1036 }
 0x385   :  { %v934_v39 = vadd.f32 1.0, %v1037_v38 }
 0x387   :  { %v1039_v40 = vpop.eup %1038  ;;  %1040 = vrcp.f32 %v934_v39  ;;  %v947_v51 = vand.u32 2147483648, %v934_v39  ;;  %v945_v54 = vand.u32 2147483647, %v934_v39  ;;  %vm941_vm4 = vweird.f32 %v934_v39 }
 0x388   :  { %v952_v41 = vmul.f32 %v1039_v40, %v935_v37  ;;  %vm957_vm14 = vweird.f32 %v1039_v40 }
 0x389   :  { %vm958_vm1 = vmor %vm956_vm15, %vm957_vm14  ;;  %v948_v57 = vor.u32 1.1754944e-38, %v947_v51  ;;  %vm946_vm6 = vcmp.eq.f32.partialorder %v945_v54, 8.507059e+37 }
 0x38a   :  { %v953_v42 = vsub.f32 1.0, %v952_v41 }
 0x38c   :  { %v954_v43 = vmul.f32 %v1039_v40, %v953_v42 }
 0x38d   :  { %v1041_v44 = vpop.eup %1040 }
 0x38e   :  { %v937_v46 = vmul.f32 %v1041_v44, %v934_v39  ;;  %v955_v47 = vadd.f32 %v1039_v40, %v954_v43  ;;  %vm942_vm2 = vweird.f32 %v1041_v44 }
 0x38f   :  { %vm943_vm5 = vmor %vm941_vm4, %vm942_vm2 }
 0x390   :  { %v938_v49 = vsub.f32 1.0, %v937_v46  ;;  %v959_v50 = vsel %vm958_vm1, %v1039_v40, %v955_v47 }
 0x391   :  { %v964_v55 = vsel %vm961_vm3, %v963_v52, %v959_v50 }
 0x392   :  { %v939_v53 = vmul.f32 %v1041_v44, %v938_v49  ;;  %v968_v59 = vrot.slane %v964_v55, 6 }
 0x394   :  { %v940_v56 = vadd.f32 %v1041_v44, %v939_v53 }
 0x396   :  { %v944_v58 = vsel %vm943_vm5, %v1041_v44, %v940_v56 }
 0x397   :  { %v949_v60 = vsel %vm946_vm6, %v948_v57, %v944_v58 }
 0x398   :  { %v969_v61 = vsel %vm212_vm0, %v949_v60, %v968_v59 }
 0x399   :  { %971 = vst [vmem:[#allocation19] sm:$0xf] %v969_v61 }
 0x39a   :  { %982 = dma.vmem_to_hbm [thread:$0]  %s978_s0, 64, %s980_s22, [#allocation4]  }
 0x39b   :  { %1318 = dma.done.wait [#allocation4], 64  }
 0x39c   :  { %1319 = vsyncadd [#allocation4], 4294967232 }
 0x39d   :  { %987 = vsyncpa [#allocation3], 1 }
 0x39e   :  { %988 = vsyncpa [#allocation6], 1 }
 0x39f   :  { %989 = vsyncpa [#allocation9], 1 }
 0x3a0   :  { %990 = vsyncpa [#allocation12], 1 }
 0x3a1   :  { %991 = vsyncpa [#allocation15], 1 }
 0x3a2   :  { %992 = vsyncpa [#allocation18], 1 }
 0x3a3   :  { %993 = vsyncpa [#allocation4], 1 }

</bundles_post_ra>
